<compile_context>
chip_gen: v7x
topology: tpu7x:2x2x1
jax: 0.10.0
libtpu: 0.0.40
codegen_flags: <defaults>
</compile_context>

<pallas_src>
import functools

import jax
import jax.numpy as jnp
from jax.experimental import pallas as pl
from jax.experimental.pallas import tpu as pltpu

NEURONS = 128          # neurons_per_layer (default)
N_HIDDEN_BLOCKS = 3    # hidden_layers (default)
IN_PAD = 8             # padded input feature dim (real = 3: x, y, t)
OUT_PAD = 128          # padded output feature dim (real = num_species*4 + 6)


def plasma_kernel(x_ref, w0_ref, b0_ref, wh_ref, bh_ref, wout_ref, bout_ref, o_ref):
    # x_ref:    (tile_n, IN_PAD)   padded [x, y, t, 0, ...]
    # w0_ref:   (IN_PAD, NEURONS), b0_ref: (1, NEURONS)
    # wh_ref:   (2*N_HIDDEN_BLOCKS, NEURONS, NEURONS)
    # bh_ref:   (2*N_HIDDEN_BLOCKS, 1, NEURONS)
    # wout_ref: (NEURONS, OUT_PAD), bout_ref: (1, OUT_PAD)
    # o_ref:    (tile_n, OUT_PAD)
    x = x_ref[...]

    # input layer + tanh
    h = jnp.tanh(
        jnp.dot(x, w0_ref[...], preferred_element_type=jnp.float32) + b0_ref[...]
    )

    # residual hidden blocks: h = tanh(h + Linear(tanh(Linear(h))))
    for blk in range(N_HIDDEN_BLOCKS):      # static unroll, 3 blocks
        w_a = wh_ref[2 * blk]
        b_a = bh_ref[2 * blk]
        w_b = wh_ref[2 * blk + 1]
        b_b = bh_ref[2 * blk + 1]
        h1 = jnp.tanh(jnp.dot(h, w_a, preferred_element_type=jnp.float32) + b_a)
        h2 = jnp.dot(h1, w_b, preferred_element_type=jnp.float32) + b_b
        h = jnp.tanh(h + h2)

    # output layer (padded to OUT_PAD lanes -> unmasked lane-dense stores)
    o_ref[...] = (
        jnp.dot(h, wout_ref[...], preferred_element_type=jnp.float32) + bout_ref[...]
    )


def _round_up(v, m):
    return ((v + m - 1) // m) * m


@functools.partial(jax.jit, static_argnames=("num_species", "tile_n"))
def plasma_net_forward(x, y, t, params, *, num_species, tile_n=512):
    """JAX wrapper replicating PlasmaNet.forward.

    x, y, t: (N, 1) float32 arrays.
    Returns (species_outputs: list of (N, 4), fields: (N, 6)).
    """
    w0, b0, wh, bh, wout, bout = params
    n = x.shape[0]

    # Clamp the tile for tiny batches (sublane-aligned), then pad N up to an exact
    # multiple of the tile.  Padded rows are zeros and get discarded below.
    tile = max(8, min(tile_n, _round_up(n, 8)))
    n_pad = _round_up(n, tile)

    inputs = jnp.concatenate([x, y, t], axis=1)                       # (N, 3)
    inputs_p = jnp.pad(
        inputs, ((0, n_pad - n), (0, IN_PAD - inputs.shape[1]))
    )                                                                 # (n_pad, IN_PAD)

    grid = (n_pad // tile,)
    out_padded = pl.pallas_call(
        plasma_kernel,
        out_shape=jax.ShapeDtypeStruct((n_pad, OUT_PAD), jnp.float32),
        grid_spec=pltpu.PrefetchScalarGridSpec(
            num_scalar_prefetch=0,
            grid=grid,
            in_specs=[
                pl.BlockSpec((tile, IN_PAD), lambda i: (i, 0)),
                pl.BlockSpec((IN_PAD, NEURONS), lambda i: (0, 0)),
                pl.BlockSpec((1, NEURONS), lambda i: (0, 0)),
                pl.BlockSpec((2 * N_HIDDEN_BLOCKS, NEURONS, NEURONS),
                             lambda i: (0, 0, 0)),
                pl.BlockSpec((2 * N_HIDDEN_BLOCKS, 1, NEURONS),
                             lambda i: (0, 0, 0)),
                pl.BlockSpec((NEURONS, OUT_PAD), lambda i: (0, 0)),
                pl.BlockSpec((1, OUT_PAD), lambda i: (0, 0)),
            ],
            out_specs=pl.BlockSpec((tile, OUT_PAD), lambda i: (i, 0)),
        ),
        compiler_params=pltpu.CompilerParams(
            dimension_semantics=("parallel",),
        ),
    )(inputs_p, w0, b0, wh, bh, wout, bout)

    output_size = num_species * 4 + 6
    outputs = out_padded[:n, :output_size]

    species_outputs = []
    offset = 0
    for _ in range(num_species):
        species_outputs.append(outputs[:, offset:offset + 4])
        offset += 4
    fields = outputs[:, offset:offset + 6]
    return species_outputs, fields


def xavier_normal(key, fan_in, fan_out):
    std = jnp.sqrt(2.0 / (fan_in + fan_out)).astype(jnp.float32)
    return std * jax.random.normal(key, (fan_in, fan_out), dtype=jnp.float32)


def init_params(key, num_species):
    """Deterministic xavier-normal weights, zero biases (like _initialize_weights)."""
    output_size = num_species * 4 + 6
    assert output_size <= OUT_PAD
    keys = jax.random.split(key, 2 + 2 * N_HIDDEN_BLOCKS)

    # Input layer: Linear(3, NEURONS). Stored transposed (in, out) for x @ W.
    w0_real = xavier_normal(keys[0], 3, NEURONS)              # (3, NEURONS)
    w0 = jnp.zeros((IN_PAD, NEURONS), jnp.float32).at[:3, :].set(w0_real)
    b0 = jnp.zeros((1, NEURONS), jnp.float32)

    # Hidden residual blocks: 2 * N_HIDDEN_BLOCKS Linear(NEURONS, NEURONS).
    wh = jnp.stack(
        [xavier_normal(keys[1 + i], NEURONS, NEURONS)
         for i in range(2 * N_HIDDEN_BLOCKS)],
        axis=0,
    )                                                          # (6, NEURONS, NEURONS)
    bh = jnp.zeros((2 * N_HIDDEN_BLOCKS, 1, NEURONS), jnp.float32)

    # Output layer: Linear(NEURONS, output_size), padded to OUT_PAD columns.
    wout_real = xavier_normal(keys[-1], NEURONS, output_size)  # (NEURONS, out)
    wout = jnp.zeros((NEURONS, OUT_PAD), jnp.float32).at[:, :output_size].set(wout_real)
    bout = jnp.zeros((1, OUT_PAD), jnp.float32)

    return (w0, b0, wh, bh, wout, bout), output_size


def reference_forward(x, y, t, params, num_species):
    """Pure-JAX reference mirroring the PyTorch forward, for correctness check."""
    w0, b0, wh, bh, wout, bout = params
    inputs = jnp.concatenate([x, y, t], axis=1)
    h = jnp.tanh(inputs @ w0[:3, :] + b0)
    for blk in range(N_HIDDEN_BLOCKS):
        h1 = jnp.tanh(h @ wh[2 * blk] + bh[2 * blk])
        h2 = h1 @ wh[2 * blk + 1] + bh[2 * blk + 1]
        h = jnp.tanh(h + h2)
    output_size = num_species * 4 + 6
    outputs = h @ wout[:, :output_size] + bout[:, :output_size]
    species = [outputs[:, i * 4:(i + 1) * 4] for i in range(num_species)]
    fields = outputs[:, num_species * 4:num_species * 4 + 6]
    return species, fields


if __name__ == "__main__":
    key = jax.random.PRNGKey(0)
    k_p, k_x, k_y, k_t = jax.random.split(key, 4)

    species_list = ["electron", "ion"]          # num_species = 2 -> output_size = 14
    num_species = len(species_list)

    # Deliberately NOT a multiple of the tile -> exercises the wrapper-side padding.
    N = 13
    x = jax.random.normal(k_x, (N, 1), dtype=jnp.float32)
    y = jax.random.normal(k_y, (N, 1), dtype=jnp.float32)
    t = jax.random.normal(k_t, (N, 1), dtype=jnp.float32)

    params, output_size = init_params(k_p, num_species)

    species_out, fields = plasma_net_forward(
        x, y, t, params, num_species=num_species
    )
    jax.block_until_ready(fields)
    for s in species_out:
        jax.block_until_ready(s)

    # sanity check vs pure-JAX reference
    ref_species, ref_fields = reference_forward(x, y, t, params, num_species)
    for a, b in zip(species_out, ref_species):
        assert a.shape == (N, 4)
        assert jnp.allclose(a, b, atol=1e-5, rtol=1e-5)
    assert fields.shape == (N, 6)
    assert jnp.allclose(fields, ref_fields, atol=1e-5, rtol=1e-5)

    print("KERNEL_OK")
</pallas_src>

<mosaic_0001>
module attributes {stable_mosaic.version = 11 : i64} {
  func.func @plasma_kernel(%arg0: i32, %arg1: memref<16x8xf32, #tpu.memory_space<vmem>>, %arg2: memref<8x128xf32, #tpu.memory_space<vmem>>, %arg3: memref<1x128xf32, #tpu.memory_space<vmem>>, %arg4: memref<6x128x128xf32, #tpu.memory_space<vmem>>, %arg5: memref<6x1x128xf32, #tpu.memory_space<vmem>>, %arg6: memref<128x128xf32, #tpu.memory_space<vmem>>, %arg7: memref<1x128xf32, #tpu.memory_space<vmem>>, %arg8: memref<16x128xf32, #tpu.memory_space<vmem>>) attributes {dimension_semantics = [#tpu.dimension_semantics<parallel>], iteration_bounds = array<i64: 1>, scalar_prefetch = 0 : i64, scratch_operands = 0 : i64, tpu.core_type = #tpu.core_type<tc>, window_params = [{transform_indices = @transform_0, window_bounds = array<i64: 16, 8>}, {pipeline_mode = #tpu.pipeline_mode<synchronous>, transform_indices = @transform_1, window_bounds = array<i64: 8, 128>}, {pipeline_mode = #tpu.pipeline_mode<synchronous>, transform_indices = @transform_2, window_bounds = array<i64: 1, 128>}, {pipeline_mode = #tpu.pipeline_mode<synchronous>, transform_indices = @transform_3, window_bounds = array<i64: 6, 128, 128>}, {pipeline_mode = #tpu.pipeline_mode<synchronous>, transform_indices = @transform_4, window_bounds = array<i64: 6, 1, 128>}, {pipeline_mode = #tpu.pipeline_mode<synchronous>, transform_indices = @transform_5, window_bounds = array<i64: 128, 128>}, {pipeline_mode = #tpu.pipeline_mode<synchronous>, transform_indices = @transform_6, window_bounds = array<i64: 1, 128>}, {transform_indices = @transform_7, window_bounds = array<i64: 16, 128>}]} {
    %c0 = arith.constant 0 : index
    %c0_0 = arith.constant 0 : index
    %0 = vector.load %arg1[%c0, %c0_0] : memref<16x8xf32, #tpu.memory_space<vmem>>, vector<16x8xf32>
    %c0_1 = arith.constant 0 : index
    %c0_2 = arith.constant 0 : index
    %1 = vector.load %arg2[%c0_1, %c0_2] : memref<8x128xf32, #tpu.memory_space<vmem>>, vector<8x128xf32>
    %cst = arith.constant dense<0.000000e+00> : vector<16x128xf32>
    %2 = tpu.matmul %0, %1, %cst {dimension_numbers = #tpu.dot_dimension_numbers<[1], [0], [0], [1], [0, 0, 1, 1], [], []>} : vector<16x8xf32>, vector<8x128xf32>, vector<16x128xf32> -> vector<16x128xf32>
    %c0_3 = arith.constant 0 : index
    %c0_4 = arith.constant 0 : index
    %3 = vector.load %arg3[%c0_3, %c0_4] : memref<1x128xf32, #tpu.memory_space<vmem>>, vector<1x128xf32>
    %4 = vector.broadcast %3 : vector<1x128xf32> to vector<16x128xf32>
    %5 = arith.addf %2, %4 : vector<16x128xf32>
    %6 = math.tanh %5 : vector<16x128xf32>
    %c0_5 = arith.constant 0 : index
    %c0_6 = arith.constant 0 : index
    %c0_7 = arith.constant 0 : index
    %7 = vector.load %arg4[%c0_5, %c0_6, %c0_7] : memref<6x128x128xf32, #tpu.memory_space<vmem>>, vector<1x128x128xf32>
    %8 = vector.shape_cast %7 : vector<1x128x128xf32> to vector<128x128xf32>
    %c0_8 = arith.constant 0 : index
    %c0_9 = arith.constant 0 : index
    %c0_10 = arith.constant 0 : index
    %9 = vector.load %arg5[%c0_8, %c0_9, %c0_10] : memref<6x1x128xf32, #tpu.memory_space<vmem>>, vector<1x1x128xf32>
    %10 = vector.shape_cast %9 : vector<1x1x128xf32> to vector<1x128xf32>
    %c1 = arith.constant 1 : index
    %c0_11 = arith.constant 0 : index
    %c0_12 = arith.constant 0 : index
    %11 = vector.load %arg4[%c1, %c0_11, %c0_12] : memref<6x128x128xf32, #tpu.memory_space<vmem>>, vector<1x128x128xf32>
    %12 = vector.shape_cast %11 : vector<1x128x128xf32> to vector<128x128xf32>
    %c1_13 = arith.constant 1 : index
    %c0_14 = arith.constant 0 : index
    %c0_15 = arith.constant 0 : index
    %13 = vector.load %arg5[%c1_13, %c0_14, %c0_15] : memref<6x1x128xf32, #tpu.memory_space<vmem>>, vector<1x1x128xf32>
    %14 = vector.shape_cast %13 : vector<1x1x128xf32> to vector<1x128xf32>
    %cst_16 = arith.constant dense<0.000000e+00> : vector<16x128xf32>
    %15 = tpu.matmul %6, %8, %cst_16 {dimension_numbers = #tpu.dot_dimension_numbers<[1], [0], [0], [1], [0, 0, 1, 1], [], []>} : vector<16x128xf32>, vector<128x128xf32>, vector<16x128xf32> -> vector<16x128xf32>
    %16 = vector.broadcast %10 : vector<1x128xf32> to vector<16x128xf32>
    %17 = arith.addf %15, %16 : vector<16x128xf32>
    %18 = math.tanh %17 : vector<16x128xf32>
    %cst_17 = arith.constant dense<0.000000e+00> : vector<16x128xf32>
    %19 = tpu.matmul %18, %12, %cst_17 {dimension_numbers = #tpu.dot_dimension_numbers<[1], [0], [0], [1], [0, 0, 1, 1], [], []>} : vector<16x128xf32>, vector<128x128xf32>, vector<16x128xf32> -> vector<16x128xf32>
    %20 = vector.broadcast %14 : vector<1x128xf32> to vector<16x128xf32>
    %21 = arith.addf %19, %20 : vector<16x128xf32>
    %22 = arith.addf %6, %21 : vector<16x128xf32>
    %23 = math.tanh %22 : vector<16x128xf32>
    %c2 = arith.constant 2 : index
    %c0_18 = arith.constant 0 : index
    %c0_19 = arith.constant 0 : index
    %24 = vector.load %arg4[%c2, %c0_18, %c0_19] : memref<6x128x128xf32, #tpu.memory_space<vmem>>, vector<1x128x128xf32>
    %25 = vector.shape_cast %24 : vector<1x128x128xf32> to vector<128x128xf32>
    %c2_20 = arith.constant 2 : index
    %c0_21 = arith.constant 0 : index
    %c0_22 = arith.constant 0 : index
    %26 = vector.load %arg5[%c2_20, %c0_21, %c0_22] : memref<6x1x128xf32, #tpu.memory_space<vmem>>, vector<1x1x128xf32>
    %27 = vector.shape_cast %26 : vector<1x1x128xf32> to vector<1x128xf32>
    %c3 = arith.constant 3 : index
    %c0_23 = arith.constant 0 : index
    %c0_24 = arith.constant 0 : index
    %28 = vector.load %arg4[%c3, %c0_23, %c0_24] : memref<6x128x128xf32, #tpu.memory_space<vmem>>, vector<1x128x128xf32>
    %29 = vector.shape_cast %28 : vector<1x128x128xf32> to vector<128x128xf32>
    %c3_25 = arith.constant 3 : index
    %c0_26 = arith.constant 0 : index
    %c0_27 = arith.constant 0 : index
    %30 = vector.load %arg5[%c3_25, %c0_26, %c0_27] : memref<6x1x128xf32, #tpu.memory_space<vmem>>, vector<1x1x128xf32>
    %31 = vector.shape_cast %30 : vector<1x1x128xf32> to vector<1x128xf32>
    %cst_28 = arith.constant dense<0.000000e+00> : vector<16x128xf32>
    %32 = tpu.matmul %23, %25, %cst_28 {dimension_numbers = #tpu.dot_dimension_numbers<[1], [0], [0], [1], [0, 0, 1, 1], [], []>} : vector<16x128xf32>, vector<128x128xf32>, vector<16x128xf32> -> vector<16x128xf32>
    %33 = vector.broadcast %27 : vector<1x128xf32> to vector<16x128xf32>
    %34 = arith.addf %32, %33 : vector<16x128xf32>
    %35 = math.tanh %34 : vector<16x128xf32>
    %cst_29 = arith.constant dense<0.000000e+00> : vector<16x128xf32>
    %36 = tpu.matmul %35, %29, %cst_29 {dimension_numbers = #tpu.dot_dimension_numbers<[1], [0], [0], [1], [0, 0, 1, 1], [], []>} : vector<16x128xf32>, vector<128x128xf32>, vector<16x128xf32> -> vector<16x128xf32>
    %37 = vector.broadcast %31 : vector<1x128xf32> to vector<16x128xf32>
    %38 = arith.addf %36, %37 : vector<16x128xf32>
    %39 = arith.addf %23, %38 : vector<16x128xf32>
    %40 = math.tanh %39 : vector<16x128xf32>
    %c4 = arith.constant 4 : index
    %c0_30 = arith.constant 0 : index
    %c0_31 = arith.constant 0 : index
    %41 = vector.load %arg4[%c4, %c0_30, %c0_31] : memref<6x128x128xf32, #tpu.memory_space<vmem>>, vector<1x128x128xf32>
    %42 = vector.shape_cast %41 : vector<1x128x128xf32> to vector<128x128xf32>
    %c4_32 = arith.constant 4 : index
    %c0_33 = arith.constant 0 : index
    %c0_34 = arith.constant 0 : index
    %43 = vector.load %arg5[%c4_32, %c0_33, %c0_34] : memref<6x1x128xf32, #tpu.memory_space<vmem>>, vector<1x1x128xf32>
    %44 = vector.shape_cast %43 : vector<1x1x128xf32> to vector<1x128xf32>
    %c5 = arith.constant 5 : index
    %c0_35 = arith.constant 0 : index
    %c0_36 = arith.constant 0 : index
    %45 = vector.load %arg4[%c5, %c0_35, %c0_36] : memref<6x128x128xf32, #tpu.memory_space<vmem>>, vector<1x128x128xf32>
    %46 = vector.shape_cast %45 : vector<1x128x128xf32> to vector<128x128xf32>
    %c5_37 = arith.constant 5 : index
    %c0_38 = arith.constant 0 : index
    %c0_39 = arith.constant 0 : index
    %47 = vector.load %arg5[%c5_37, %c0_38, %c0_39] : memref<6x1x128xf32, #tpu.memory_space<vmem>>, vector<1x1x128xf32>
    %48 = vector.shape_cast %47 : vector<1x1x128xf32> to vector<1x128xf32>
    %cst_40 = arith.constant dense<0.000000e+00> : vector<16x128xf32>
    %49 = tpu.matmul %40, %42, %cst_40 {dimension_numbers = #tpu.dot_dimension_numbers<[1], [0], [0], [1], [0, 0, 1, 1], [], []>} : vector<16x128xf32>, vector<128x128xf32>, vector<16x128xf32> -> vector<16x128xf32>
    %50 = vector.broadcast %44 : vector<1x128xf32> to vector<16x128xf32>
    %51 = arith.addf %49, %50 : vector<16x128xf32>
    %52 = math.tanh %51 : vector<16x128xf32>
    %cst_41 = arith.constant dense<0.000000e+00> : vector<16x128xf32>
    %53 = tpu.matmul %52, %46, %cst_41 {dimension_numbers = #tpu.dot_dimension_numbers<[1], [0], [0], [1], [0, 0, 1, 1], [], []>} : vector<16x128xf32>, vector<128x128xf32>, vector<16x128xf32> -> vector<16x128xf32>
    %54 = vector.broadcast %48 : vector<1x128xf32> to vector<16x128xf32>
    %55 = arith.addf %53, %54 : vector<16x128xf32>
    %56 = arith.addf %40, %55 : vector<16x128xf32>
    %57 = math.tanh %56 : vector<16x128xf32>
    %c0_42 = arith.constant 0 : index
    %c0_43 = arith.constant 0 : index
    %58 = vector.load %arg6[%c0_42, %c0_43] : memref<128x128xf32, #tpu.memory_space<vmem>>, vector<128x128xf32>
    %cst_44 = arith.constant dense<0.000000e+00> : vector<16x128xf32>
    %59 = tpu.matmul %57, %58, %cst_44 {dimension_numbers = #tpu.dot_dimension_numbers<[1], [0], [0], [1], [0, 0, 1, 1], [], []>} : vector<16x128xf32>, vector<128x128xf32>, vector<16x128xf32> -> vector<16x128xf32>
    %c0_45 = arith.constant 0 : index
    %c0_46 = arith.constant 0 : index
    %60 = vector.load %arg7[%c0_45, %c0_46] : memref<1x128xf32, #tpu.memory_space<vmem>>, vector<1x128xf32>
    %61 = vector.broadcast %60 : vector<1x128xf32> to vector<16x128xf32>
    %62 = arith.addf %59, %61 : vector<16x128xf32>
    %c0_47 = arith.constant 0 : index
    %c0_48 = arith.constant 0 : index
    %63 = vector.load %arg8[%c0_47, %c0_48] : memref<16x128xf32, #tpu.memory_space<vmem>>, vector<16x128xf32>
    tpu.vector_store %arg8[%c0_47, %c0_48], %62 {strides = array<i32>} : memref<16x128xf32, #tpu.memory_space<vmem>>, vector<16x128xf32>,
    return
  }
  func.func @transform_0(%arg0: i32) -> (i32, i32) {
    %c0_i32 = arith.constant 0 : i32
    %c0_i32_0 = arith.constant 0 : i32
    return %arg0, %c0_i32 : i32, i32
  }
  func.func @transform_1(%arg0: i32) -> (i32, i32) {
    %c0_i32 = arith.constant 0 : i32
    %c0_i32_0 = arith.constant 0 : i32
    %c0_i32_1 = arith.constant 0 : i32
    return %c0_i32, %c0_i32_0 : i32, i32
  }
  func.func @transform_2(%arg0: i32) -> (i32, i32) {
    %c0_i32 = arith.constant 0 : i32
    %c0_i32_0 = arith.constant 0 : i32
    %c0_i32_1 = arith.constant 0 : i32
    return %c0_i32, %c0_i32_0 : i32, i32
  }
  func.func @transform_3(%arg0: i32) -> (i32, i32, i32) {
    %c0_i32 = arith.constant 0 : i32
    %c0_i32_0 = arith.constant 0 : i32
    %c0_i32_1 = arith.constant 0 : i32
    %c0_i32_2 = arith.constant 0 : i32
    return %c0_i32, %c0_i32_0, %c0_i32_1 : i32, i32, i32
  }
  func.func @transform_4(%arg0: i32) -> (i32, i32, i32) {
    %c0_i32 = arith.constant 0 : i32
    %c0_i32_0 = arith.constant 0 : i32
    %c0_i32_1 = arith.constant 0 : i32
    %c0_i32_2 = arith.constant 0 : i32
    return %c0_i32, %c0_i32_0, %c0_i32_1 : i32, i32, i32
  }
  func.func @transform_5(%arg0: i32) -> (i32, i32) {
    %c0_i32 = arith.constant 0 : i32
    %c0_i32_0 = arith.constant 0 : i32
    %c0_i32_1 = arith.constant 0 : i32
    return %c0_i32, %c0_i32_0 : i32, i32
  }
  func.func @transform_6(%arg0: i32) -> (i32, i32) {
    %c0_i32 = arith.constant 0 : i32
    %c0_i32_0 = arith.constant 0 : i32
    %c0_i32_1 = arith.constant 0 : i32
    return %c0_i32, %c0_i32_0 : i32, i32
  }
  func.func @transform_7(%arg0: i32) -> (i32, i32) {
    %c0_i32 = arith.constant 0 : i32
    %c0_i32_0 = arith.constant 0 : i32
    return %arg0, %c0_i32 : i32, i32
  }
}

</mosaic_0001>

<bundles_post_ra>
// kernel: plasma_net_forward.1
= control target key start
LH: loop header
LB: loop body
LE: loop exit
PB: predicated region body
PF: predicated region fallthrough
CT: control target
= control target key end

     0   :  { %12 = vsyncpa [#allocation3], 0  ;;  %s1699_s0 = inlined_call_operand.vmem [shape: f32[16,8], index: 0, kind: input, shape index: {}]   ;;  %s1700_s1 = inlined_call_operand.vmem [shape: f32[8,128], index: 1, kind: input, shape index: {}]   ;;  %s1701_s2 = inlined_call_operand.vmem [shape: f32[1,128], index: 2, kind: input, shape index: {}]   ;;  %s1702_s3 = inlined_call_operand.hbm [shape: f32[6,128,128], index: 3, kind: input, shape index: {}]   ;;  %s1703_s4 = inlined_call_operand.vmem [shape: f32[6,1,128], index: 4, kind: input, shape index: {}]   ;;  %s1704_s5 = inlined_call_operand.hbm [shape: f32[128,128], index: 5, kind: input, shape index: {}]   ;;  %s1705_s6 = inlined_call_operand.vmem [shape: f32[1,128], index: 6, kind: input, shape index: {}]   ;;  %s1706_s7 = inlined_call_operand.vmem [shape: f32[16,128], index: 7, kind: output, shape index: {}]  }
   0x1   :  { %13 = vsyncpa [#allocation5], 0  ;;  %s1568_s24 = smov [#allocation2]   ;;  %s1520_s28 = scalar_lea.hbm %s1702_s3, 12288 }
   0x2   :  { %s25_s25 = sshll.u32 %s1568_s24, 4  ;;  %p1521_p0 = scmp.ne.s32.totalorder %s1702_s3, %s1520_s28  ;;  %s26_s25 = int_to_ptr.vmem [resolvable:$true] %s25_s25 }
   0x3   :  { %p1524_p1 = scmp.lt.u32.totalorder %s1520_s28, %s1702_s3 }
   0x5   :  { %p1526_p2 = pnand %p1524_p1, %p1521_p0 }
   0x7   :  { %1529 = shalt.err (!%p1526_p2)
}
   0x8   :  { %s1530_s10 = scalar_lea.vmem %s26_s25, 12288  ;;  %p1535_p4 = scmp.lt.s32.totalorder %s26_s25, %s26_s25 }
   0x9   :  { %p1531_p3 = scmp.ne.s32.totalorder %s26_s25, %s1530_s10  ;;  %p1536_p5 = scmp.lt.s32.totalorder %s1530_s10, %s1530_s10 }
   0xb   :  { %p1537_p6 = por %p1536_p5, %p1535_p4 }
   0xd   :  { %p1538_p7 = pnand %p1537_p6, %p1531_p3 }
   0xf   :  { %1541 = shalt.err (!%p1538_p7)
}
  0x10   :  { %s1569_s11 = smov 128   ;;  %s1570_s12 = smov 8  }
  0x11   :  { %31 = dma.hbm_to_vmem [thread:$0]  %s1702_s3, 12288, %s26_s25, [#allocation3], %s1569_s11, %s1569_s11, %s1570_s12  }
  0x12   :  { %s1571_s15 = smov [#allocation4]   ;;  %s1542_s19 = scalar_lea.hbm %s1704_s5, 2048 }
  0x13   :  { %s39_s16 = sshll.u32 %s1571_s15, 4  ;;  %p1543_p8 = scmp.ne.s32.totalorder %s1704_s5, %s1542_s19  ;;  %s40_s16 = int_to_ptr.vmem [resolvable:$true] %s39_s16 }
  0x14   :  { %p1546_p9 = scmp.lt.u32.totalorder %s1542_s19, %s1704_s5 }
  0x16   :  { %p1548_p10 = pnand %p1546_p9, %p1543_p8 }
  0x18   :  { %1551 = shalt.err (!%p1548_p10)
}
  0x19   :  { %s1552_s24 = scalar_lea.vmem %s40_s16, 2048  ;;  %p1557_p12 = scmp.lt.s32.totalorder %s40_s16, %s40_s16 }
  0x1a   :  { %p1553_p11 = scmp.ne.s32.totalorder %s40_s16, %s1552_s24  ;;  %p1558_p13 = scmp.lt.s32.totalorder %s1552_s24, %s1552_s24 }
  0x1c   :  { %p1559_p0 = por %p1558_p13, %p1557_p12 }
  0x1e   :  { %p1560_p1 = pnand %p1559_p0, %p1553_p11 }
  0x20   :  { %1563 = shalt.err (!%p1560_p1)
}
  0x21   :  { %45 = dma.hbm_to_vmem [thread:$0]  %s1704_s5, 2048, %s40_s16, [#allocation5], %s1569_s11, %s1569_s11, %s1570_s12  }
  0x22   :  { %1564 = dma.done.wait [#allocation3], 12288  }
  0x23   :  { %1565 = vsyncadd [#allocation3], 4294955008 }
  0x24   :  { %1566 = dma.done.wait [#allocation5], 2048  }
  0x25   :  { %1567 = vsyncadd [#allocation5], 4294965248  ;;  %vm64_vm0 = vcmask 64512   ;;  %v56_v0 = vld [vmem:[%s1700_s1] sm:$0xff]  ;;  %v55_v2 = vld [vmem:[%s1699_s0 + $0x8] sm:$0xff] }
  0x26   :  { %v54_v1 = vld [vmem:[%s1699_s0] sm:$0xff]  ;;  %1014 = vmatprep.subr.mxu0 %v56_v0  ;;  %v149_v4 = vld [vmem:[#allocation2 + $0x8] sm:$0xff]  ;;  %v150_v5 = vld [vmem:[#allocation2 + $0x10] sm:$0xff] }
  0x27   :  { %1016 = vmatprep.mubr.msk.f32.mxu0 %vm64_vm0, %v54_v1  ;;  %v148_v3 = vld [vmem:[#allocation2] sm:$0xff]  ;;  %1015 = vmatpush3.msra.mxu0 %v56_v0  ;;  %v151_v7 = vld [vmem:[#allocation2 + $0x18] sm:$0xff]  ;;  %v153_v10 = vld [vmem:[#allocation2 + $0x28] sm:$0xff] }
  0x28   :  { %v1264_v6 = vpack.c.bf16 %v149_v4, %v148_v3  ;;  %1017 = vmatmul.mubr.msk.f32.vlgmr.msra.gmra.mrb[0].mxu0 %vm64_vm0, %v55_v2  ;;  %v1268_v8 = vpack.c.bf16 %v151_v7, %v150_v5  ;;  %v152_v9 = vld [vmem:[#allocation2 + $0x20] sm:$0xff]  ;;  %v154_v12 = vld [vmem:[#allocation2 + $0x30] sm:$0xff]  ;;  %v155_v13 = vld [vmem:[#allocation2 + $0x38] sm:$0xff] }
  0x29   :  { %v1272_v11 = vpack.c.bf16 %v153_v10, %v152_v9  ;;  %v1276_v14 = vpack.c.bf16 %v155_v13, %v154_v12  ;;  %v156_v15 = vld [vmem:[#allocation2 + $0x40] sm:$0xff]  ;;  %v157_v16 = vld [vmem:[#allocation2 + $0x48] sm:$0xff]  ;;  %v158_v18 = vld [vmem:[#allocation2 + $0x50] sm:$0xff] }
  0x2a   :  { %1265 = vmatprep.subr.bf16.mxu1 %v1264_v6  ;;  %v1280_v17 = vpack.c.bf16 %v157_v16, %v156_v15  ;;  %v159_v19 = vld [vmem:[#allocation2 + $0x58] sm:$0xff]  ;;  %v160_v21 = vld [vmem:[#allocation2 + $0x60] sm:$0xff]  ;;  %v161_v22 = vld [vmem:[#allocation2 + $0x68] sm:$0xff] }
  0x2b   :  { %1267 = vmatpush3.bf16.msra.mxu1 %v1264_v6  ;;  %v1284_v20 = vpack.c.bf16 %v159_v19, %v158_v18  ;;  %v162_v23 = vld [vmem:[#allocation2 + $0x70] sm:$0xff]  ;;  %v1288_v24 = vpack.c.bf16 %v161_v22, %v160_v21  ;;  %v163_v25 = vld [vmem:[#allocation2 + $0x78] sm:$0xff]  ;;  %v166_v27 = vld [vmem:[#allocation2 + $0x80] sm:$0xff] }
  0x2c   :  { %1269 = vmatprep.subr.bf16.mxu1 %v1268_v8  ;;  %v1292_v26 = vpack.c.bf16 %v163_v25, %v162_v23  ;;  %v167_v28 = vld [vmem:[#allocation2 + $0x88] sm:$0xff]  ;;  %v168_v29 = vld [vmem:[#allocation2 + $0x90] sm:$0xff]  ;;  %v169_v31 = vld [vmem:[#allocation2 + $0x98] sm:$0xff] }
  0x2d   :  { %v1296_v30 = vpack.c.bf16 %v167_v28, %v166_v27  ;;  %v1300_v32 = vpack.c.bf16 %v169_v31, %v168_v29  ;;  %v170_v33 = vld [vmem:[#allocation2 + $0xa0] sm:$0xff]  ;;  %v171_v34 = vld [vmem:[#allocation2 + $0xa8] sm:$0xff]  ;;  %v172_v36 = vld [vmem:[#allocation2 + $0xb0] sm:$0xff] }
  0x2e   :  { %v1304_v35 = vpack.c.bf16 %v171_v34, %v170_v33  ;;  %v173_v37 = vld [vmem:[#allocation2 + $0xb8] sm:$0xff]  ;;  %v870_v39 = vld [vmem:[%s1701_s2] ss:$0 sm:$0xff]  ;;  %v175_v47 = vld [vmem:[#allocation2 + $0xc8] sm:$0xff] }
  0x2f   :  { %1271 = vmatpush3.bf16.msra.mxu1 %v1268_v8  ;;  %1297 = vmatprep.subr.bf16.mxu0 %v1296_v30  ;;  %v1308_v38 = vpack.c.bf16 %v173_v37, %v172_v36  ;;  %v174_v46 = vld [vmem:[#allocation2 + $0xc0] sm:$0xff]  ;;  %v176_v49 = vld [vmem:[#allocation2 + $0xd0] sm:$0xff]  ;;  %v177_v50 = vld [vmem:[#allocation2 + $0xd8] sm:$0xff] }
  0x30   :  { %1273 = vmatprep.subr.bf16.mxu1 %v1272_v11  ;;  %1299 = vmatpush3.bf16.msra.mxu0 %v1296_v30  ;;  %v1312_v48 = vpack.c.bf16 %v175_v47, %v174_v46  ;;  %v1316_v51 = vpack.c.bf16 %v177_v50, %v176_v49  ;;  %v178_v52 = vld [vmem:[#allocation2 + $0xe0] sm:$0xff]  ;;  %v179_v53 = vld [vmem:[#allocation2 + $0xe8] sm:$0xff]  ;;  %v180_v54 = vld [vmem:[#allocation2 + $0xf0] sm:$0xff] }
  0x31   :  { %1301 = vmatprep.subr.bf16.mxu0 %v1300_v32  ;;  %v1320_v55 = vpack.c.bf16 %v179_v53, %v178_v52  ;;  %v181_v56 = vld [vmem:[#allocation2 + $0xf8] sm:$0xff]  ;;  %v353_v58 = vld [vmem:[#allocation2 + $0x100] sm:$0xff]  ;;  %v354_v59 = vld [vmem:[#allocation2 + $0x108] sm:$0xff] }
  0x32   :  { %v1324_v57 = vpack.c.bf16 %v181_v56, %v180_v54  ;;  %v355_v60 = vld [vmem:[#allocation2 + $0x110] sm:$0xff]  ;;  %v1328_v61 = vpack.c.bf16 %v354_v59, %v353_v58  ;;  %v356_v62 = vld [vmem:[#allocation2 + $0x118] sm:$0xff]  ;;  %v357_v0 = vld [vmem:[#allocation2 + $0x120] sm:$0xff] }
  0x33   :  { %1275 = vmatpush3.bf16.msra.mxu1 %v1272_v11  ;;  %v1332_v63 = vpack.c.bf16 %v356_v62, %v355_v60  ;;  %v358_v1 = vld [vmem:[#allocation2 + $0x128] sm:$0xff]  ;;  %v359_v3 = vld [vmem:[#allocation2 + $0x130] sm:$0xff]  ;;  %v360_v4 = vld [vmem:[#allocation2 + $0x138] sm:$0xff] }
  0x34   :  { %1277 = vmatprep.subr.bf16.mxu1 %v1276_v14  ;;  %1303 = vmatpush3.bf16.msra.mxu0 %v1300_v32  ;;  %v1336_v2 = vpack.c.bf16 %v358_v1, %v357_v0  ;;  %v1340_v5 = vpack.c.bf16 %v360_v4, %v359_v3  ;;  %v874_v6 = vld [vmem:[%s1703_s4] ss:$0 sm:$0xff]  ;;  %v363_v16 = vld [vmem:[#allocation2 + $0x150] sm:$0xff]  ;;  %v368_v23 = vld [vmem:[#allocation2 + $0x178] sm:$0xff] }
  0x35   :  { %1305 = vmatprep.subr.bf16.mxu0 %v1304_v35  ;;  %v361_v13 = vld [vmem:[#allocation2 + $0x140] sm:$0xff]  ;;  %v367_v21 = vld [vmem:[#allocation2 + $0x170] sm:$0xff]  ;;  %v375_v29 = vld [vmem:[#allocation2 + $0x198] sm:$0xff] }
  0x36   :  { %v365_v19 = vld [vmem:[#allocation2 + $0x160] sm:$0xff]  ;;  %v374_v27 = vld [vmem:[#allocation2 + $0x190] sm:$0xff]  ;;  %v377_v32 = vld [vmem:[#allocation2 + $0x1a8] sm:$0xff] }
  0x37   :  { %1279 = vmatpush3.bf16.msra.mxu1 %v1276_v14  ;;  %v362_v14 = vld [vmem:[#allocation2 + $0x148] sm:$0xff]  ;;  %v372_v25 = vld [vmem:[#allocation2 + $0x180] sm:$0xff]  ;;  %v1364_v30 = vpack.c.bf16 %v375_v29, %v374_v27  ;;  %v378_v34 = vld [vmem:[#allocation2 + $0x1b0] sm:$0xff] }
  0x38   :  { %1281 = vmatprep.subr.bf16.mxu1 %v1280_v17  ;;  %1307 = vmatpush3.bf16.msra.mxu0 %v1304_v35  ;;  %v1344_v15 = vpack.c.bf16 %v362_v14, %v361_v13  ;;  %v376_v31 = vld [vmem:[#allocation2 + $0x1a0] sm:$0xff]  ;;  %v379_v35 = vld [vmem:[#allocation2 + $0x1b8] sm:$0xff]  ;;  %v381_v49 = vld [vmem:[#allocation2 + $0x1c8] sm:$0xff] }
  0x39   :  { %1309 = vmatprep.subr.bf16.mxu0 %v1308_v38  ;;  %v1368_v33 = vpack.c.bf16 %v377_v32, %v376_v31  ;;  %v1372_v36 = vpack.c.bf16 %v379_v35, %v378_v34  ;;  %v875_v37 = vld [vmem:[%s1703_s4 + $0x1] ss:$0 sm:$0xff]  ;;  %v383_v52 = vld [vmem:[#allocation2 + $0x1d8] sm:$0xff]  ;;  %v385_v53 = vld [vmem:[#allocation2 + $0x1e8] sm:$0xff] }
  0x3a   :  { %v386_v54 = vld [vmem:[#allocation2 + $0x1f0] sm:$0xff]  ;;  %v387_v56 = vld [vmem:[#allocation2 + $0x1f8] sm:$0xff]  ;;  %v559_v58 = vld [vmem:[#allocation2 + $0x200] sm:$0xff] }
  0x3b   :  { %1283 = vmatpush3.bf16.msra.mxu1 %v1280_v17  ;;  %v364_v17 = vld [vmem:[#allocation2 + $0x158] sm:$0xff]  ;;  %v560_v59 = vld [vmem:[#allocation2 + $0x208] sm:$0xff]  ;;  %v561_v60 = vld [vmem:[#allocation2 + $0x210] sm:$0xff] }
  0x3c   :  { %1285 = vmatprep.subr.bf16.mxu1 %v1284_v20  ;;  %1311 = vmatpush3.bf16.msra.mxu0 %v1308_v38  ;;  %v1348_v18 = vpack.c.bf16 %v364_v17, %v363_v16  ;;  %v562_v62 = vld [vmem:[#allocation2 + $0x218] sm:$0xff]  ;;  %v563_v0 = vld [vmem:[#allocation2 + $0x220] sm:$0xff]  ;;  %v564_v1 = vld [vmem:[#allocation2 + $0x228] sm:$0xff] }
  0x3d   :  { %1313 = vmatprep.subr.bf16.mxu0 %v1312_v48  ;;  %v565_v3 = vld [vmem:[#allocation2 + $0x230] sm:$0xff]  ;;  %v566_v4 = vld [vmem:[#allocation2 + $0x238] sm:$0xff]  ;;  %v567_v13 = vld [vmem:[#allocation2 + $0x240] sm:$0xff] }
  0x3e   :  { %v568_v14 = vld [vmem:[#allocation2 + $0x248] sm:$0xff]  ;;  %v569_v16 = vld [vmem:[#allocation2 + $0x250] sm:$0xff]  ;;  %v570_v17 = vld [vmem:[#allocation2 + $0x258] sm:$0xff] }
  0x3f   :  { %1287 = vmatpush3.bf16.msra.mxu1 %v1284_v20  ;;  %v366_v20 = vld [vmem:[#allocation2 + $0x168] sm:$0xff]  ;;  %v580_v27 = vld [vmem:[#allocation2 + $0x290] sm:$0xff]  ;;  %v581_v29 = vld [vmem:[#allocation2 + $0x298] sm:$0xff] }
  0x40   :  { %1289 = vmatprep.subr.bf16.mxu1 %v1288_v24  ;;  %1315 = vmatpush3.bf16.msra.mxu0 %v1312_v48  ;;  %v1352_v22 = vpack.c.bf16 %v366_v20, %v365_v19  ;;  %v380_v48 = vld [vmem:[#allocation2 + $0x1c0] sm:$0xff]  ;;  %v572_v20 = vld [vmem:[#allocation2 + $0x268] sm:$0xff]  ;;  %v584_v34 = vld [vmem:[#allocation2 + $0x2b0] sm:$0xff] }
  0x41   :  { %1317 = vmatprep.subr.bf16.mxu0 %v1316_v51  ;;  %v1376_v50 = vpack.c.bf16 %v381_v49, %v380_v48  ;;  %v571_v19 = vld [vmem:[#allocation2 + $0x260] sm:$0xff]  ;;  %v583_v32 = vld [vmem:[#allocation2 + $0x2a8] sm:$0xff]  ;;  %v585_v35 = vld [vmem:[#allocation2 + $0x2b8] sm:$0xff] }
  0x42   :  { %v582_v31 = vld [vmem:[#allocation2 + $0x2a0] sm:$0xff] }
  0x43   :  { %1291 = vmatpush3.bf16.msra.mxu1 %v1288_v24  ;;  %v1356_v24 = vpack.c.bf16 %v368_v23, %v367_v21  ;;  %v573_v21 = vld [vmem:[#allocation2 + $0x270] sm:$0xff]  ;;  %v574_v23 = vld [vmem:[#allocation2 + $0x278] sm:$0xff] }
  0x44   :  { %1293 = vmatprep.subr.bf16.mxu1 %v1292_v26  ;;  %1319 = vmatpush3.bf16.msra.mxu0 %v1316_v51  ;;  %v382_v51 = vld [vmem:[#allocation2 + $0x1d0] sm:$0xff] }
  0x45   :  { %1321 = vmatprep.subr.bf16.mxu0 %v1320_v55 }
  0x47   :  { %1295 = vmatpush3.bf16.msra.mxu1 %v1292_v26  ;;  %v373_v26 = vld [vmem:[#allocation2 + $0x188] sm:$0xff] }
  0x48   :  { %1323 = vmatpush3.bf16.msra.mxu0 %v1320_v55  ;;  %1329 = vmatprep.subr.bf16.mxu1 %v1328_v61  ;;  %v1360_v28 = vpack.c.bf16 %v373_v26, %v372_v25  ;;  %v578_v25 = vld [vmem:[#allocation2 + $0x280] sm:$0xff]  ;;  %v579_v26 = vld [vmem:[#allocation2 + $0x288] sm:$0xff] }
  0x49   :  { %1325 = vmatprep.subr.bf16.mxu0 %v1324_v57 }
  0x4c   :  { %1327 = vmatpush3.bf16.msra.mxu0 %v1324_v57  ;;  %v1388_v57 = vpack.c.bf16 %v387_v56, %v386_v54  ;;  %v592_v54 = vld [vmem:[#allocation2 + $0x2f0] sm:$0xff]  ;;  %v593_v56 = vld [vmem:[#allocation2 + $0x2f8] sm:$0xff] }
  0x4d   :  { %1361 = vmatprep.subr.bf16.mxu0 %v1360_v28 }
  0xfb   :  { %v1018_v40 = vpop.f32.mrb[0].mxu0 }
  0xfc   :  { %v143_v41 = vadd.f32 %v1018_v40, %v870_v39  ;;  %v137_v42 = vpop.f32.mrb[1].mxu0 }
  0xfd   :  { %v138_v43 = vadd.f32 %v870_v39, %v137_v42 }
  0xff   :  { %1492 = vtanh.f32 %v138_v43 }
 0x100   :  { %1494 = vtanh.f32 %v143_v41 }
 0x109   :  { %v1648_v44 = vpop.eup %1492 }
 0x10a   :  { %v1650_v45 = vpop.eup %1494  ;;  %1051 = vmatprep.mubr.f32.mxu1 %v1648_v44 }
 0x10b   :  { %1052 = vmatmul.mubr.f32.vlgmr.msra.gmra.mrb[0].mxu1 %v1650_v45 }
 0x10c   :  { %1331 = vmatpush3.bf16.msra.mxu1 %v1328_v61  ;;  %v1392_v61 = vpack.c.bf16 %v560_v59, %v559_v58  ;;  %v764_v58 = vld [vmem:[#allocation4] sm:$0xff]  ;;  %v765_v59 = vld [vmem:[#allocation4 + $0x8] sm:$0xff] }
 0x10d   :  { %1333 = vmatprep.subr.bf16.mxu1 %v1332_v63 }
 0x110   :  { %1335 = vmatpush3.bf16.msra.mxu1 %v1332_v63  ;;  %v1396_v63 = vpack.c.bf16 %v562_v62, %v561_v60  ;;  %v766_v60 = vld [vmem:[#allocation4 + $0x10] sm:$0xff]  ;;  %v767_v62 = vld [vmem:[#allocation4 + $0x18] sm:$0xff] }
 0x111   :  { %1337 = vmatprep.subr.bf16.mxu1 %v1336_v2 }
 0x114   :  { %1339 = vmatpush3.bf16.msra.mxu1 %v1336_v2  ;;  %v1400_v2 = vpack.c.bf16 %v564_v1, %v563_v0  ;;  %v768_v0 = vld [vmem:[#allocation4 + $0x20] sm:$0xff]  ;;  %v769_v1 = vld [vmem:[#allocation4 + $0x28] sm:$0xff] }
 0x115   :  { %1341 = vmatprep.subr.bf16.mxu1 %v1340_v5 }
 0x118   :  { %1343 = vmatpush3.bf16.msra.mxu1 %v1340_v5  ;;  %v1404_v5 = vpack.c.bf16 %v566_v4, %v565_v3  ;;  %v770_v3 = vld [vmem:[#allocation4 + $0x30] sm:$0xff]  ;;  %v771_v4 = vld [vmem:[#allocation4 + $0x38] sm:$0xff] }
 0x119   :  { %1345 = vmatprep.subr.bf16.mxu1 %v1344_v15 }
 0x11c   :  { %1347 = vmatpush3.bf16.msra.mxu1 %v1344_v15  ;;  %v1408_v15 = vpack.c.bf16 %v568_v14, %v567_v13  ;;  %v772_v13 = vld [vmem:[#allocation4 + $0x40] sm:$0xff]  ;;  %v773_v14 = vld [vmem:[#allocation4 + $0x48] sm:$0xff] }
 0x11d   :  { %1349 = vmatprep.subr.bf16.mxu1 %v1348_v18 }
 0x120   :  { %1351 = vmatpush3.bf16.msra.mxu1 %v1348_v18  ;;  %v1412_v18 = vpack.c.bf16 %v570_v17, %v569_v16  ;;  %v774_v16 = vld [vmem:[#allocation4 + $0x50] sm:$0xff]  ;;  %v775_v17 = vld [vmem:[#allocation4 + $0x58] sm:$0xff] }
 0x121   :  { %1353 = vmatprep.subr.bf16.mxu1 %v1352_v22 }
 0x124   :  { %1355 = vmatpush3.bf16.msra.mxu1 %v1352_v22  ;;  %v1416_v22 = vpack.c.bf16 %v572_v20, %v571_v19  ;;  %v776_v19 = vld [vmem:[#allocation4 + $0x60] sm:$0xff]  ;;  %v777_v20 = vld [vmem:[#allocation4 + $0x68] sm:$0xff] }
 0x125   :  { %1357 = vmatprep.subr.bf16.mxu1 %v1356_v24 }
 0x128   :  { %1359 = vmatpush3.bf16.msra.mxu1 %v1356_v24  ;;  %v1420_v24 = vpack.c.bf16 %v574_v23, %v573_v21  ;;  %v778_v21 = vld [vmem:[#allocation4 + $0x70] sm:$0xff]  ;;  %v779_v23 = vld [vmem:[#allocation4 + $0x78] sm:$0xff] }
 0x129   :  { %1393 = vmatprep.subr.bf16.mxu1 %v1392_v61 }
 0x1de   :  { %v1053_v7 = vpop.f32.mrb[0].mxu1 }
 0x1df   :  { %v262_v8 = vadd.f32 %v1053_v7, %v874_v6  ;;  %v256_v9 = vpop.f32.mrb[1].mxu1 }
 0x1e0   :  { %v257_v10 = vadd.f32 %v874_v6, %v256_v9  ;;  %v878_v6 = vld [vmem:[%s1703_s4 + $0x2] ss:$0 sm:$0xff] }
 0x1e2   :  { %1496 = vtanh.f32 %v257_v10 }
 0x1e3   :  { %1498 = vtanh.f32 %v262_v8 }
 0x1ec   :  { %v1497_v11 = vpop.eup %1496 }
 0x1ed   :  { %v1499_v12 = vpop.eup %1498  ;;  %1086 = vmatprep.mubr.f32.mxu0 %v1497_v11 }
 0x1ee   :  { %1087 = vmatmul.mubr.f32.vlgmr.msra.gmra.mrb[2].mxu0 %v1499_v12 }
 0x1ef   :  { %1363 = vmatpush3.bf16.msra.mxu0 %v1360_v28  ;;  %v1424_v28 = vpack.c.bf16 %v579_v26, %v578_v25  ;;  %v883_v25 = vld [vmem:[%s1703_s4 + $0x5] ss:$0 sm:$0xff] }
 0x1f0   :  { %1365 = vmatprep.subr.bf16.mxu0 %v1364_v30 }
 0x1f3   :  { %1367 = vmatpush3.bf16.msra.mxu0 %v1364_v30  ;;  %v1428_v30 = vpack.c.bf16 %v581_v29, %v580_v27 }
 0x1f4   :  { %1369 = vmatprep.subr.bf16.mxu0 %v1368_v33 }
 0x1f7   :  { %1371 = vmatpush3.bf16.msra.mxu0 %v1368_v33  ;;  %v1432_v33 = vpack.c.bf16 %v583_v32, %v582_v31 }
 0x1f8   :  { %1373 = vmatprep.subr.bf16.mxu0 %v1372_v36 }
 0x1fb   :  { %1375 = vmatpush3.bf16.msra.mxu0 %v1372_v36  ;;  %v1436_v36 = vpack.c.bf16 %v585_v35, %v584_v34  ;;  %v884_v34 = vld [vmem:[%s1705_s6] ss:$0 sm:$0xff] }
 0x1fc   :  { %1377 = vmatprep.subr.bf16.mxu0 %v1376_v50 }
 0x1ff   :  { %1379 = vmatpush3.bf16.msra.mxu0 %v1376_v50  ;;  %v586_v50 = vld [vmem:[#allocation2 + $0x2c0] sm:$0xff] }
 0x2c1   :  { %v1088_v38 = vpop.f32.mrb[2].mxu0 }
 0x2c2   :  { %v345_v39 = vadd.f32 %v1088_v38, %v875_v37  ;;  %v339_v40 = vpop.f32.mrb[3].mxu0 }
 0x2c3   :  { %v340_v41 = vadd.f32 %v875_v37, %v339_v40  ;;  %v879_v37 = vld [vmem:[%s1703_s4 + $0x3] ss:$0 sm:$0xff] }
 0x2c4   :  { %v349_v42 = vadd.f32 %v1650_v45, %v345_v39  ;;  %v1380_v45 = vpack.c.bf16 %v383_v52, %v382_v51  ;;  %v587_v51 = vld [vmem:[#allocation2 + $0x2c8] sm:$0xff] }
 0x2c5   :  { %v348_v43 = vadd.f32 %v1648_v44, %v340_v41  ;;  %v384_v44 = vld [vmem:[#allocation2 + $0x1e0] sm:$0xff]  ;;  %v1440_v52 = vpack.c.bf16 %v587_v51, %v586_v50 }
 0x2c6   :  { %1381 = vmatprep.subr.bf16.mxu0 %v1380_v45  ;;  %v1384_v55 = vpack.c.bf16 %v385_v53, %v384_v44  ;;  %v589_v44 = vld [vmem:[#allocation2 + $0x2d8] sm:$0xff]  ;;  %v591_v53 = vld [vmem:[#allocation2 + $0x2e8] sm:$0xff] }
 0x2c7   :  { %1500 = vtanh.f32 %v348_v43  ;;  %1383 = vmatpush3.bf16.msra.mxu0 %v1380_v45  ;;  %v588_v45 = vld [vmem:[#allocation2 + $0x2d0] sm:$0xff] }
 0x2c8   :  { %1502 = vtanh.f32 %v349_v42  ;;  %1385 = vmatprep.subr.bf16.mxu0 %v1384_v55 }
 0x2cb   :  { %1387 = vmatpush3.bf16.msra.mxu0 %v1384_v55 }
 0x2cc   :  { %1389 = vmatprep.subr.bf16.mxu0 %v1388_v57 }
 0x2cf   :  { %1391 = vmatpush3.bf16.msra.mxu0 %v1388_v57  ;;  %v1452_v57 = vpack.c.bf16 %v593_v56, %v592_v54 }
 0x2d0   :  { %1425 = vmatprep.subr.bf16.mxu0 %v1424_v28 }
 0x2d1   :  { %v1662_v46 = vpop.eup %1500 }
 0x2d2   :  { %v1664_v47 = vpop.eup %1502  ;;  %1121 = vmatprep.mubr.f32.mxu1 %v1662_v46 }
 0x2d3   :  { %1122 = vmatmul.mubr.f32.vlgmr.msra.gmra.mrb[2].mxu1 %v1664_v47 }
 0x2d4   :  { %1395 = vmatpush3.bf16.msra.mxu1 %v1392_v61  ;;  %v1456_v61 = vpack.c.bf16 %v765_v59, %v764_v58 }
 0x2d5   :  { %1397 = vmatprep.subr.bf16.mxu1 %v1396_v63 }
 0x2d8   :  { %1399 = vmatpush3.bf16.msra.mxu1 %v1396_v63  ;;  %v1460_v63 = vpack.c.bf16 %v767_v62, %v766_v60 }
 0x2d9   :  { %1401 = vmatprep.subr.bf16.mxu1 %v1400_v2 }
 0x2dc   :  { %1403 = vmatpush3.bf16.msra.mxu1 %v1400_v2  ;;  %v1464_v2 = vpack.c.bf16 %v769_v1, %v768_v0 }
 0x2dd   :  { %1405 = vmatprep.subr.bf16.mxu1 %v1404_v5 }
 0x2e0   :  { %1407 = vmatpush3.bf16.msra.mxu1 %v1404_v5  ;;  %v1468_v5 = vpack.c.bf16 %v771_v4, %v770_v3 }
 0x2e1   :  { %1409 = vmatprep.subr.bf16.mxu1 %v1408_v15 }
 0x2e4   :  { %1411 = vmatpush3.bf16.msra.mxu1 %v1408_v15  ;;  %v1472_v15 = vpack.c.bf16 %v773_v14, %v772_v13 }
 0x2e5   :  { %1413 = vmatprep.subr.bf16.mxu1 %v1412_v18 }
 0x2e8   :  { %1415 = vmatpush3.bf16.msra.mxu1 %v1412_v18  ;;  %v1476_v18 = vpack.c.bf16 %v775_v17, %v774_v16 }
 0x2e9   :  { %1417 = vmatprep.subr.bf16.mxu1 %v1416_v22 }
 0x2ec   :  { %1419 = vmatpush3.bf16.msra.mxu1 %v1416_v22  ;;  %v1480_v22 = vpack.c.bf16 %v777_v20, %v776_v19 }
 0x2ed   :  { %1421 = vmatprep.subr.bf16.mxu1 %v1420_v24 }
 0x2f0   :  { %1423 = vmatpush3.bf16.msra.mxu1 %v1420_v24  ;;  %v1484_v24 = vpack.c.bf16 %v779_v23, %v778_v21 }
 0x2f1   :  { %1457 = vmatprep.subr.bf16.mxu1 %v1456_v61 }
 0x3a6   :  { %v1123_v7 = vpop.f32.mrb[2].mxu1 }
 0x3a7   :  { %v468_v8 = vadd.f32 %v1123_v7, %v878_v6  ;;  %v462_v9 = vpop.f32.mrb[3].mxu1 }
 0x3a8   :  { %v463_v10 = vadd.f32 %v878_v6, %v462_v9  ;;  %v882_v6 = vld [vmem:[%s1703_s4 + $0x4] ss:$0 sm:$0xff] }
 0x3aa   :  { %1504 = vtanh.f32 %v463_v10 }
 0x3ab   :  { %1506 = vtanh.f32 %v468_v8 }
 0x3b4   :  { %v1505_v11 = vpop.eup %1504 }
 0x3b5   :  { %v1507_v12 = vpop.eup %1506  ;;  %1156 = vmatprep.mubr.f32.mxu0 %v1505_v11 }
 0x3b6   :  { %1157 = vmatmul.mubr.f32.vlgmr.msra.gmra.mrb[4].mxu0 %v1507_v12 }
 0x3b7   :  { %1427 = vmatpush3.bf16.msra.mxu0 %v1424_v28 }
 0x3b8   :  { %1429 = vmatprep.subr.bf16.mxu0 %v1428_v30 }
 0x3bb   :  { %1431 = vmatpush3.bf16.msra.mxu0 %v1428_v30 }
 0x3bc   :  { %1433 = vmatprep.subr.bf16.mxu0 %v1432_v33 }
 0x3bf   :  { %1435 = vmatpush3.bf16.msra.mxu0 %v1432_v33 }
 0x3c0   :  { %1437 = vmatprep.subr.bf16.mxu0 %v1436_v36 }
 0x3c3   :  { %1439 = vmatpush3.bf16.msra.mxu0 %v1436_v36 }
 0x3c4   :  { %1441 = vmatprep.subr.bf16.mxu0 %v1440_v52 }
 0x3c7   :  { %1443 = vmatpush3.bf16.msra.mxu0 %v1440_v52 }
 0x489   :  { %v1158_v38 = vpop.f32.mrb[4].mxu0 }
 0x48a   :  { %v551_v39 = vadd.f32 %v1158_v38, %v879_v37  ;;  %v545_v40 = vpop.f32.mrb[5].mxu0 }
 0x48b   :  { %v546_v41 = vadd.f32 %v879_v37, %v545_v40 }
 0x48c   :  { %v555_v42 = vadd.f32 %v1664_v47, %v551_v39  ;;  %v1444_v47 = vpack.c.bf16 %v589_v44, %v588_v45 }
 0x48d   :  { %v554_v43 = vadd.f32 %v1662_v46, %v546_v41  ;;  %v590_v46 = vld [vmem:[#allocation2 + $0x2e0] sm:$0xff] }
 0x48e   :  { %1445 = vmatprep.subr.bf16.mxu0 %v1444_v47  ;;  %v1448_v55 = vpack.c.bf16 %v591_v53, %v590_v46 }
 0x48f   :  { %1508 = vtanh.f32 %v554_v43  ;;  %1447 = vmatpush3.bf16.msra.mxu0 %v1444_v47 }
 0x490   :  { %1510 = vtanh.f32 %v555_v42  ;;  %1449 = vmatprep.subr.bf16.mxu0 %v1448_v55 }
 0x493   :  { %1451 = vmatpush3.bf16.msra.mxu0 %v1448_v55 }
 0x494   :  { %1453 = vmatprep.subr.bf16.mxu0 %v1452_v57 }
 0x497   :  { %1455 = vmatpush3.bf16.msra.mxu0 %v1452_v57 }
 0x499   :  { %v1676_v48 = vpop.eup %1508 }
 0x49a   :  { %v1678_v49 = vpop.eup %1510  ;;  %1191 = vmatprep.mubr.f32.mxu1 %v1676_v48 }
 0x49b   :  { %1192 = vmatmul.mubr.f32.vlgmr.msra.gmra.mrb[4].mxu1 %v1678_v49 }
 0x49c   :  { %1459 = vmatpush3.bf16.msra.mxu1 %v1456_v61 }
 0x49d   :  { %1461 = vmatprep.subr.bf16.mxu1 %v1460_v63 }
 0x4a0   :  { %1463 = vmatpush3.bf16.msra.mxu1 %v1460_v63 }
 0x4a1   :  { %1465 = vmatprep.subr.bf16.mxu1 %v1464_v2 }
 0x4a4   :  { %1467 = vmatpush3.bf16.msra.mxu1 %v1464_v2 }
 0x4a5   :  { %1469 = vmatprep.subr.bf16.mxu1 %v1468_v5 }
 0x4a8   :  { %1471 = vmatpush3.bf16.msra.mxu1 %v1468_v5 }
 0x4a9   :  { %1473 = vmatprep.subr.bf16.mxu1 %v1472_v15 }
 0x4ac   :  { %1475 = vmatpush3.bf16.msra.mxu1 %v1472_v15 }
 0x4ad   :  { %1477 = vmatprep.subr.bf16.mxu1 %v1476_v18 }
 0x4b0   :  { %1479 = vmatpush3.bf16.msra.mxu1 %v1476_v18 }
 0x4b1   :  { %1481 = vmatprep.subr.bf16.mxu1 %v1480_v22 }
 0x4b4   :  { %1483 = vmatpush3.bf16.msra.mxu1 %v1480_v22 }
 0x4b5   :  { %1485 = vmatprep.subr.bf16.mxu1 %v1484_v24 }
 0x4b8   :  { %1487 = vmatpush3.bf16.msra.mxu1 %v1484_v24 }
 0x56e   :  { %v1193_v7 = vpop.f32.mrb[4].mxu1 }
 0x56f   :  { %v674_v8 = vadd.f32 %v1193_v7, %v882_v6  ;;  %v668_v9 = vpop.f32.mrb[5].mxu1 }
 0x570   :  { %v669_v10 = vadd.f32 %v882_v6, %v668_v9 }
 0x572   :  { %1512 = vtanh.f32 %v669_v10 }
 0x573   :  { %1514 = vtanh.f32 %v674_v8 }
 0x57c   :  { %v1513_v11 = vpop.eup %1512 }
 0x57d   :  { %v1515_v12 = vpop.eup %1514  ;;  %1226 = vmatprep.mubr.f32.mxu0 %v1513_v11 }
 0x57e   :  { %1227 = vmatmul.mubr.f32.vlgmr.msra.gmra.mrb[6].mxu0 %v1515_v12 }
 0x651   :  { %v1228_v26 = vpop.f32.mrb[6].mxu0 }
 0x652   :  { %v757_v27 = vadd.f32 %v1228_v26, %v883_v25  ;;  %v751_v28 = vpop.f32.mrb[7].mxu0 }
 0x653   :  { %v752_v29 = vadd.f32 %v883_v25, %v751_v28 }
 0x654   :  { %v761_v30 = vadd.f32 %v1678_v49, %v757_v27 }
 0x655   :  { %v760_v31 = vadd.f32 %v1676_v48, %v752_v29 }
 0x657   :  { %1516 = vtanh.f32 %v760_v31 }
 0x658   :  { %1518 = vtanh.f32 %v761_v30 }
 0x661   :  { %v1517_v32 = vpop.eup %1516 }
 0x662   :  { %v1519_v33 = vpop.eup %1518  ;;  %1261 = vmatprep.mubr.f32.mxu1 %v1517_v32 }
 0x663   :  { %1262 = vmatmul.mubr.f32.vlgmr.msra.gmra.mrb[6].mxu1 %v1519_v33 }
 0x736   :  { %v1263_v35 = vpop.f32.mrb[6].mxu1 }
 0x737   :  { %v859_v36 = vadd.f32 %v1263_v35, %v884_v34  ;;  %v853_v37 = vpop.f32.mrb[7].mxu1 }
 0x738   :  { %v854_v38 = vadd.f32 %v884_v34, %v853_v37 }
 0x739   :  { %863 = vst [vmem:[%s1706_s7 + $0x8] sm:$0xff] %v859_v36 }
 0x73a   :  { %862 = vst [vmem:[%s1706_s7] sm:$0xff] %v854_v38 }
 0x73b   :  { %868 = vsyncpa [#allocation3], 1 }
 0x73c   :  { %869 = vsyncpa [#allocation5], 1 }

</bundles_post_ra>
